<compile_context>
chip_gen: v5e
topology: v5e:2x2
jax: 0.10.0
libtpu: 0.0.40
codegen_flags: <defaults>
</compile_context>

<pallas_src>
import jax
import jax.numpy as jnp
from jax.experimental import pallas as pl
from jax.experimental.pallas import tpu as pltpu


def _round_up(v, m):
    return ((v + m - 1) // m) * m


def gin_kernel(adj_ref, xw1_ref, b1_ref, w2_ref, b2_ref, out_ref, acc_ref):
    k = pl.program_id(1)

    @pl.when(k == 0)
    def _init():
        acc_ref[...] = jnp.zeros_like(acc_ref)

    # Dominant matmul: (tm, tk) adj tile (f32 in HBM, cast to bf16 here — the
    # VPU is idle under the HBM-bound adj stream so the cast is free filler)
    # against the pre-fused (tk, op) bf16 (x @ W1) tile; f32 accumulation.
    acc_ref[...] += jnp.dot(
        adj_ref[...].astype(jnp.bfloat16), xw1_ref[...],
        preferred_element_type=jnp.float32)

    @pl.when(k == pl.num_programs(1) - 1)
    def _epilogue():
        # MLP: bias + ReLU, second Linear, bias + ReLU.  f32 epilogue math,
        # bf16 MXU operand for the second matmul, bf16 store (lane-dense).
        h = jnp.maximum(acc_ref[...] + b1_ref[...], 0.0)
        o = jnp.dot(h.astype(jnp.bfloat16), w2_ref[...],
                    preferred_element_type=jnp.float32)
        out_ref[...] = jnp.maximum(o + b2_ref[...], 0.0).astype(out_ref.dtype)


def graph_convolution(adj, x, w1_t, b1, w2_t, b2, *, tm=256, tk=1024,
                      out_dtype=jnp.bfloat16):
    """Fused GIN layer: relu(relu((adj @ x) @ W1^T + b1) @ W2^T + b2).

    adj:  (N, N) float32 dense Laplacian / adjacency
    x:    (N, in_dim) float32
    w1_t: (in_dim, out_dim)   PyTorch Linear weight, pre-transposed
    b1:   (1, out_dim)
    w2_t: (out_dim, out_dim)  pre-transposed
    b2:   (1, out_dim)
    """
    N, in_dim = x.shape
    out_dim = w1_t.shape[1]

    # Lane-dense output: pad out_dim to a multiple of 128.
    op = _round_up(out_dim, 128)

    # Tile sizes forced to multiples of 128 (clean MXU LHS feeding, no packed
    # bf16 sublane edge cases, unmasked output stores), clamped to the problem.
    tm = _round_up(min(tm, _round_up(N, 128)), 128)
    tk = _round_up(min(tk, _round_up(N, 128)), 128)
    np_ = _round_up(N, tm)
    nk_ = _round_up(N, tk)

    # adj stays f32 in HBM: no wrapper pad+cast copy of the N^2 stream (the
    # bf16 cast happens per-tile inside the kernel).  Zero padding is exact:
    # padded adj columns hit padded (zero) xw1 rows; padded weight/bias lanes
    # produce relu(0) = 0 columns that are sliced off below.
    adj_p = adj
    if (np_, nk_) != adj.shape:
        adj_p = jnp.pad(adj, ((0, np_ - N), (0, nk_ - N)))

    # Associativity hoist: (adj @ x) @ W1 == adj @ (x @ W1).  Precompute once
    # in f32, then pad + cast to bf16 as the K-streamed RHS.
    xw1 = jnp.dot(x, w1_t, precision=jax.lax.Precision.HIGHEST)
    xw1_p = jnp.pad(xw1, ((0, nk_ - N), (0, op - out_dim))).astype(jnp.bfloat16)

    b1_p = jnp.pad(b1, ((0, 0), (0, op - out_dim))).astype(jnp.float32)
    w2_p = jnp.pad(w2_t, ((0, op - out_dim), (0, op - out_dim))).astype(jnp.bfloat16)
    b2_p = jnp.pad(b2, ((0, 0), (0, op - out_dim))).astype(jnp.float32)

    grid = (np_ // tm, nk_ // tk)

    # Right-sized VMEM budget: double-buffered streamed inputs (adj f32, xw1
    # bf16), 2x for the constant-index resident inputs, 2x bf16 output buffers,
    # plus the f32 accumulator scratch; 2x headroom, capped at 48 MiB so it
    # stays inside v7x's 64 MiB per-TC VMEM (v5e/v6e have 128 MiB).
    need = (2 * (tm * tk * 4 + tk * op * 2)      # adj + xw1 streams
            + 2 * (op * op * 2 + 2 * op * 4)     # W2 + b1 + b2 (resident)
            + 2 * tm * op * 2                    # output buffers (bf16)
            + tm * op * 4)                       # accumulator scratch
    vmem_limit = int(min(max(2 * need + (8 << 20), 16 << 20), 48 << 20))

    flops = 2 * np_ * nk_ * op + 2 * np_ * op * op
    bytes_accessed = (np_ * nk_ * 4                    # adj stream (f32)
                      + (np_ // tm) * nk_ * op * 2     # xw1 re-streamed per row tile
                      + op * op * 2 + 2 * op * 4       # weights / biases
                      + np_ * op * 2)                  # bf16 output
    cost = pl.CostEstimate(flops=int(flops), transcendentals=0,
                           bytes_accessed=int(bytes_accessed))

    out_p = pl.pallas_call(
        gin_kernel,
        out_shape=jax.ShapeDtypeStruct((np_, op), out_dtype),
        grid=grid,
        in_specs=[
            # adj: streamed (tm, tk) tiles, double-buffered by Pallas.
            pl.BlockSpec((tm, tk), lambda i, k: (i, k)),
            # x @ W1: streamed along K in (tk, op) tiles.
            pl.BlockSpec((tk, op), lambda i, k: (k, 0)),
            # Biases / W2: resident (constant block index).
            pl.BlockSpec((1, op), lambda i, k: (0, 0)),
            pl.BlockSpec((op, op), lambda i, k: (0, 0)),
            pl.BlockSpec((1, op), lambda i, k: (0, 0)),
        ],
        # Output block constant along K (accumulator pattern; written at k==last).
        out_specs=pl.BlockSpec((tm, op), lambda i, k: (i, 0)),
        scratch_shapes=[pltpu.VMEM((tm, op), jnp.float32)],
        compiler_params=pltpu.CompilerParams(
            dimension_semantics=("parallel", "arbitrary"),
            vmem_limit_bytes=vmem_limit,
        ),
        cost_estimate=cost,
    )(adj_p, xw1_p, b1_p, w2_p, b2_p)

    return out_p[:N, :out_dim]


def init_linear(key, in_dim, out_dim):
    """Deterministic PyTorch-style Linear init: U(-1/sqrt(in), 1/sqrt(in))."""
    kw, kb = jax.random.split(key)
    bound = 1.0 / jnp.sqrt(jnp.float32(in_dim))
    # Stored already transposed: (in_dim, out_dim)
    w_t = jax.random.uniform(kw, (in_dim, out_dim), jnp.float32, -bound, bound)
    b = jax.random.uniform(kb, (1, out_dim), jnp.float32, -bound, bound)
    return w_t, b


if __name__ == "__main__":
    key = jax.random.PRNGKey(0)
    k_adj, k_x, k_l1, k_l2 = jax.random.split(key, 4)

    N = 256        # graph nodes (2 row tiles x 2 K tiles -> exercises both axes)
    in_dim = 32    # input feature dimension
    out_dim = 64   # output feature dimension

    x = jax.random.normal(k_x, (N, in_dim), jnp.float32)
    adj = jax.random.normal(k_adj, (N, N), jnp.float32)  # dense Laplacian-like

    w1_t, b1 = init_linear(k_l1, in_dim, out_dim)
    w2_t, b2 = init_linear(k_l2, out_dim, out_dim)

    out = graph_convolution(adj, x, w1_t, b1, w2_t, b2, tm=128, tk=128)
    out = jax.block_until_ready(out)
    assert out.shape == (N, out_dim)
    out_f32 = out.astype(jnp.float32)

    hi = jax.lax.Precision.HIGHEST

    # Reference 1: mirrors the kernel's bf16 MXU operands / f32 accumulation /
    # associativity hoist (tight check that the kernel does what we claim).
    xw1_r = jnp.dot(x, w1_t, precision=hi).astype(jnp.bfloat16)
    agg_r = jnp.dot(adj.astype(jnp.bfloat16), xw1_r,
                    preferred_element_type=jnp.float32)
    h_r = jnp.maximum(agg_r + b1, 0.0)
    o_r = jnp.dot(h_r.astype(jnp.bfloat16), w2_t.astype(jnp.bfloat16),
                  preferred_element_type=jnp.float32)
    ref_mxu = jnp.maximum(o_r + b2, 0.0)
    err1 = float(jnp.max(jnp.abs(out_f32 - ref_mxu)))
    assert jnp.allclose(out_f32, ref_mxu, atol=2e-1, rtol=2e-2), err1

    # Reference 2: pure f32 PyTorch semantics (loose tolerance: the only
    # divergence is the bf16 MXU inputs / bf16 output).
    agg32 = jnp.dot(adj, x, precision=hi)
    h32 = jnp.maximum(jnp.dot(agg32, w1_t, precision=hi) + b1, 0.0)
    ref32 = jnp.maximum(jnp.dot(h32, w2_t, precision=hi) + b2, 0.0)
    err2 = float(jnp.max(jnp.abs(out_f32 - ref32)))
    assert jnp.allclose(out_f32, ref32, atol=1.0, rtol=1e-1), err2

    print("KERNEL_OK")
</pallas_src>

<mosaic_0001>
module attributes {stable_mosaic.version = 11 : i64} {
  func.func @gin_kernel(%arg0: i32, %arg1: i32, %arg2: memref<128x128xf32, #tpu.memory_space<vmem>>, %arg3: memref<128x128xbf16, #tpu.memory_space<vmem>>, %arg4: memref<1x128xf32, #tpu.memory_space<vmem>>, %arg5: memref<128x128xbf16, #tpu.memory_space<vmem>>, %arg6: memref<1x128xf32, #tpu.memory_space<vmem>>, %arg7: memref<128x128xbf16, #tpu.memory_space<vmem>>, %arg8: memref<128x128xf32, #tpu.memory_space<vmem>>) attributes {dimension_semantics = [#tpu.dimension_semantics<parallel>, #tpu.dimension_semantics<arbitrary>], iteration_bounds = array<i64: 2, 2>, scalar_prefetch = 0 : i64, scratch_operands = 1 : i64, tpu.core_type = #tpu.core_type<tc>, window_params = [{transform_indices = @transform_0, window_bounds = array<i64: 128, 128>}, {transform_indices = @transform_1, window_bounds = array<i64: 128, 128>}, {pipeline_mode = #tpu.pipeline_mode<synchronous>, transform_indices = @transform_2, window_bounds = array<i64: 1, 128>}, {pipeline_mode = #tpu.pipeline_mode<synchronous>, transform_indices = @transform_3, window_bounds = array<i64: 128, 128>}, {pipeline_mode = #tpu.pipeline_mode<synchronous>, transform_indices = @transform_4, window_bounds = array<i64: 1, 128>}, {transform_indices = @transform_5, window_bounds = array<i64: 128, 128>}]} {
    %c0_i32 = arith.constant 0 : i32
    %0 = arith.cmpi eq, %arg1, %c0_i32 : i32
    %1 = arith.extui %0 : i1 to i32
    %c0_i32_0 = arith.constant 0 : i32
    %2 = arith.cmpi ne, %1, %c0_i32_0 : i32
    scf.if %2 {
      %cst_9 = arith.constant 0.000000e+00 : f32
      %13 = vector.broadcast %cst_9 : f32 to vector<128x128xf32>
      %c0_10 = arith.constant 0 : index
      %c0_11 = arith.constant 0 : index
      %14 = vector.load %arg8[%c0_10, %c0_11] : memref<128x128xf32, #tpu.memory_space<vmem>>, vector<128x128xf32>
      tpu.vector_store %arg8[%c0_10, %c0_11], %13 {strides = array<i32>} : memref<128x128xf32, #tpu.memory_space<vmem>>, vector<128x128xf32>,
    } else {
    }
    %c0 = arith.constant 0 : index
    %c0_1 = arith.constant 0 : index
    %3 = vector.load %arg8[%c0, %c0_1] : memref<128x128xf32, #tpu.memory_space<vmem>>, vector<128x128xf32>
    %c0_2 = arith.constant 0 : index
    %c0_3 = arith.constant 0 : index
    %4 = vector.load %arg2[%c0_2, %c0_3] : memref<128x128xf32, #tpu.memory_space<vmem>>, vector<128x128xf32>
    %5 = arith.truncf %4 : vector<128x128xf32> to vector<128x128xbf16>
    %c0_4 = arith.constant 0 : index
    %c0_5 = arith.constant 0 : index
    %6 = vector.load %arg3[%c0_4, %c0_5] : memref<128x128xbf16, #tpu.memory_space<vmem>>, vector<128x128xbf16>
    %cst = arith.constant dense<0.000000e+00> : vector<128x128xf32>
    %7 = tpu.matmul %5, %6, %cst {dimension_numbers = #tpu.dot_dimension_numbers<[1], [0], [0], [1], [0, 0, 1, 1], [], []>} : vector<128x128xbf16>, vector<128x128xbf16>, vector<128x128xf32> -> vector<128x128xf32>
    %8 = arith.addf %3, %7 : vector<128x128xf32>
    %c0_6 = arith.constant 0 : index
    %c0_7 = arith.constant 0 : index
    %9 = vector.load %arg8[%c0_6, %c0_7] : memref<128x128xf32, #tpu.memory_space<vmem>>, vector<128x128xf32>
    tpu.vector_store %arg8[%c0_6, %c0_7], %8 {strides = array<i32>} : memref<128x128xf32, #tpu.memory_space<vmem>>, vector<128x128xf32>,
    %c1_i32 = arith.constant 1 : i32
    %10 = arith.cmpi eq, %arg1, %c1_i32 : i32
    %11 = arith.extui %10 : i1 to i32
    %c0_i32_8 = arith.constant 0 : i32
    %12 = arith.cmpi ne, %11, %c0_i32_8 : i32
    scf.if %12 {
      %c0_9 = arith.constant 0 : index
      %c0_10 = arith.constant 0 : index
      %13 = vector.load %arg8[%c0_9, %c0_10] : memref<128x128xf32, #tpu.memory_space<vmem>>, vector<128x128xf32>
      %c0_11 = arith.constant 0 : index
      %c0_12 = arith.constant 0 : index
      %14 = vector.load %arg4[%c0_11, %c0_12] : memref<1x128xf32, #tpu.memory_space<vmem>>, vector<1x128xf32>
      %15 = vector.broadcast %14 : vector<1x128xf32> to vector<128x128xf32>
      %16 = arith.addf %13, %15 : vector<128x128xf32>
      %cst_13 = arith.constant 0.000000e+00 : f32
      %17 = vector.broadcast %cst_13 : f32 to vector<128x128xf32>
      %18 = arith.maximumf %16, %17 : vector<128x128xf32>
      %19 = arith.truncf %18 : vector<128x128xf32> to vector<128x128xbf16>
      %c0_14 = arith.constant 0 : index
      %c0_15 = arith.constant 0 : index
      %20 = vector.load %arg5[%c0_14, %c0_15] : memref<128x128xbf16, #tpu.memory_space<vmem>>, vector<128x128xbf16>
      %cst_16 = arith.constant dense<0.000000e+00> : vector<128x128xf32>
      %21 = tpu.matmul %19, %20, %cst_16 {dimension_numbers = #tpu.dot_dimension_numbers<[1], [0], [0], [1], [0, 0, 1, 1], [], []>} : vector<128x128xbf16>, vector<128x128xbf16>, vector<128x128xf32> -> vector<128x128xf32>
      %c0_17 = arith.constant 0 : index
      %c0_18 = arith.constant 0 : index
      %22 = vector.load %arg6[%c0_17, %c0_18] : memref<1x128xf32, #tpu.memory_space<vmem>>, vector<1x128xf32>
      %23 = vector.broadcast %22 : vector<1x128xf32> to vector<128x128xf32>
      %24 = arith.addf %21, %23 : vector<128x128xf32>
      %cst_19 = arith.constant 0.000000e+00 : f32
      %25 = vector.broadcast %cst_19 : f32 to vector<128x128xf32>
      %26 = arith.maximumf %24, %25 : vector<128x128xf32>
      %27 = arith.truncf %26 : vector<128x128xf32> to vector<128x128xbf16>
      %c0_20 = arith.constant 0 : index
      %c0_21 = arith.constant 0 : index
      %28 = vector.load %arg7[%c0_20, %c0_21] : memref<128x128xbf16, #tpu.memory_space<vmem>>, vector<128x128xbf16>
      tpu.vector_store %arg7[%c0_20, %c0_21], %27 {strides = array<i32>} : memref<128x128xbf16, #tpu.memory_space<vmem>>, vector<128x128xbf16>,
    } else {
    }
    return
  }
  func.func @transform_0(%arg0: i32, %arg1: i32) -> (i32, i32) {
    %c0_i32 = arith.constant 0 : i32
    return %arg0, %arg1 : i32, i32
  }
  func.func @transform_1(%arg0: i32, %arg1: i32) -> (i32, i32) {
    %c0_i32 = arith.constant 0 : i32
    %c0_i32_0 = arith.constant 0 : i32
    return %arg1, %c0_i32 : i32, i32
  }
  func.func @transform_2(%arg0: i32, %arg1: i32) -> (i32, i32) {
    %c0_i32 = arith.constant 0 : i32
    %c0_i32_0 = arith.constant 0 : i32
    %c0_i32_1 = arith.constant 0 : i32
    return %c0_i32, %c0_i32_0 : i32, i32
  }
  func.func @transform_3(%arg0: i32, %arg1: i32) -> (i32, i32) {
    %c0_i32 = arith.constant 0 : i32
    %c0_i32_0 = arith.constant 0 : i32
    %c0_i32_1 = arith.constant 0 : i32
    return %c0_i32, %c0_i32_0 : i32, i32
  }
  func.func @transform_4(%arg0: i32, %arg1: i32) -> (i32, i32) {
    %c0_i32 = arith.constant 0 : i32
    %c0_i32_0 = arith.constant 0 : i32
    %c0_i32_1 = arith.constant 0 : i32
    return %c0_i32, %c0_i32_0 : i32, i32
  }
  func.func @transform_5(%arg0: i32, %arg1: i32) -> (i32, i32) {
    %c0_i32 = arith.constant 0 : i32
    %c0_i32_0 = arith.constant 0 : i32
    return %arg0, %c0_i32 : i32, i32
  }
}

</mosaic_0001>

<bundles_post_ra>
// kernel: tpu_custom_call.1
= control target key start
LH: loop header
LB: loop body
LE: loop exit
PB: predicated region body
PF: predicated region fallthrough
CT: control target
= control target key end

     0   :  { %s1860_s0 = inlined_call_operand.hbm [shape: f32[256,256], index: 0, kind: input, shape index: {}]   ;;  %s1861_s1 = inlined_call_operand.hbm [shape: bf16[256,128], index: 1, kind: input, shape index: {}]   ;;  %s1862_s2 = inlined_call_operand.vmem [shape: f32[1,128], index: 2, kind: input, shape index: {}]   ;;  %s1863_s3 = inlined_call_operand.hbm [shape: bf16[128,128], index: 3, kind: input, shape index: {}]   ;;  %s1864_s4 = inlined_call_operand.vmem [shape: f32[1,128], index: 4, kind: input, shape index: {}]   ;;  %s1865_s5 = inlined_call_operand.hbm [shape: bf16[256,128], index: 5, kind: output, shape index: {}]  }
   0x1   :  { %1877 = sst [smem:[#allocation25_spill]] %s1860_s0 }
   0x2   :  { %1878 = sst [smem:[#allocation26_spill]] %s1862_s2 }
   0x3   :  { %1879 = sst [smem:[#allocation27_spill]] %s1863_s3 }
   0x4   :  { %1880 = sst [smem:[#allocation28_spill]] %s1864_s4 }
   0x5   :  { %1881 = sst [smem:[#allocation29_spill]] %s1865_s5 }
   0x6   :  { %10 = vsyncpa [#allocation4], 0 }
   0x7   :  { %12 = vsyncpa [#allocation4 + $0x1], 0 }
   0x8   :  { %13 = vsyncpa [#allocation7], 0 }
   0x9   :  { %15 = vsyncpa [#allocation7 + $0x1], 0 }
   0xa   :  { %16 = vsyncpa [#allocation5], 0 }
   0xb   :  { %18 = vsyncpa [#allocation5 + $0x1], 0  ;;  %s1529_s18 = smov 0   ;;  %s1531_s19 = smov 0  }
   0xc   :  { %s1533_s20 = smov 0   ;;  %s1535_s21 = smov 0  }
   0xd   :  { %s1537_s22 = smov 0   ;;  %s1539_s23 = smov 0  }
   0xe   :  { %s1541_s24 = smov 0   ;;  %s1543_s25 = smov 0  }
   0xf   :  { %s1545_s26 = smov 0   ;;  %s1547_s27 = smov 0  }
  0x10   :  { %s1549_s28 = smov 0   ;;  %s1551_s29 = smov 0  }
  0x11   :  { %s1553_s30 = smov 0   ;;  %s1555_s6 = smov 0  }
  0x12 LB: > { %1882 = sst [smem:[#allocation14_spill]] %s1436_s18  ;;  %s1596_s7 = sadd.s32 4294967295, %s1488_s6   ;;  %s1488_s6 = sphi %s1555_s6, %s24_s6   ;;  %s1484_s30 = sphi %s1553_s30, %s1930_s30   ;;  %s1480_s29 = sphi %s1551_s29, %s1929_s29   ;;  %s1476_s28 = sphi %s1549_s28, %s1917_s28   ;;  %s1472_s27 = sphi %s1547_s27, %s1928_s27   ;;  %s1468_s26 = sphi %s1545_s26, %s1916_s26   ;;  %s1464_s25 = sphi %s1543_s25, %s1927_s25   ;;  %s1460_s24 = sphi %s1541_s24, %s1926_s24   ;;  %s1456_s23 = sphi %s1539_s23, %s1925_s23   ;;  %s1452_s22 = sphi %s1537_s22, %s1924_s22   ;;  %s1448_s21 = sphi %s1535_s21, %s1923_s21   ;;  %s1444_s20 = sphi %s1533_s20, %s1922_s20   ;;  %s1440_s19 = sphi %s1531_s19, %s1921_s19   ;;  %s1436_s18 = sphi %s1529_s18, %s1920_s18  }
  0x13   : > { %1883 = sst [smem:[#allocation15_spill]] %s1468_s26  ;;  %s891_s8 = sadd.s32 4294967294, %s1488_s6  }
  0x14   : > { %1884 = sst [smem:[#allocation16_spill]] %s1472_s27  ;;  %p58_p0 = scmp.ne.s32.totalorder %s1464_s25, %s1460_s24 }
  0x15   : > { %1885 = sst [smem:[#allocation17_spill]] %s1476_s28  ;;  %p59_p1 = scmp.eq.s32.totalorder %s1596_s7, 0 }
  0x16   : > { %1886 = sst [smem:[#allocation18_spill]] %s1484_s30  ;;  %p84_p2 = scmp.ne.s32.totalorder %s1452_s22, %s1448_s21 }
  0x17   : > { %p170_p3 = scmp.ne.s32.totalorder %s1444_s20, %s1440_s19  ;;  %p1606_p4 = por %p59_p1, %p58_p0 }
  0x18   : > { %p171_p5 = scmp.eq.s32.totalorder %s1596_s7, 3  ;;  %p1613_p6 = por %p84_p2, %p59_p1 }
  0x19   : > { %p176_p7 = scmp.ne.s32.totalorder %s1440_s19, %s1436_s18  ;;  %p177_p9 = scmp.eq.s32.totalorder %s891_s8, 3 }
  0x1a   : > { %p1619_p8 = por %p171_p5, %p170_p3  ;;  %p892_p10 = scmp.ge.s32.totalorder %s1488_s6, 1 }
  0x1b   : > { %p184_p11 = scmp.lt.s32.totalorder %s1488_s6, 5  ;;  %p1625_p12 = por %p177_p9, %p176_p7 }
  0x1c   : > { %s1889_s11 = scalar_select %p1619_p8, 1, 0 }
  0x1d   : > { %s1891_s12 = scalar_select %p1625_p12, 1, 0 }
  0x1e   : > { %1890 = sst [smem:[#allocation19_spill]] %s1889_s11  ;;  %p1629_p13 = pnand %p892_p10, %p184_p11 }
  0x1f   : > { %1892 = sst [smem:[#allocation20_spill]] %s1891_s12  ;;  %s1490_s17 = smov [#allocation8]  }
  0x20   : > { %s1894_s3 = sld [smem:[#allocation27_spill]]  ;;  %p1102_p0 = pneg %p1629_p13 }
  0x21   : > { %s200_s21 = sshll.u32 %s1490_s17, 4  ;;  %s1866_s24 = smov 64   ;;  %s201_s21 = int_to_ptr.vmem [resolvable:$true] %s200_s21 }
  0x22   : > { %p1103_p2 = pnand %p1102_p0, %p59_p1  ;;  %s1867_s8 = smov 4  }
  0x23   : > { %s33_s14 = sadd.s32 1, %s1480_s29  ;;  %s36_s15 = sadd.s32 1, %s1484_s30 }
  0x24   : > { %p34_p3 = scmp.ge.s32.totalorder %s33_s14, 2  ;;  %p52_p5 = scmp.ne.s32.totalorder %s1468_s26, %s1464_s25 }
  0x25   : > { %p53_p7 = scmp.eq.s32.totalorder %s1488_s6, 0  ;;  %p1118_p0 = scmp.lt.s32.totalorder %s1488_s6, 4 }
  0x26   : > { %s198_s16 = sshll.u32 %s1894_s3, 4  ;;  %s45_s3 = sadd.s32 1, %s1468_s26  ;;  %s199_s16 = int_to_ptr.hbm [resolvable:$true] %s198_s16 }
  0x27   : > { %1105 = dma.hbm_to_vmem [thread:$0]  (!%p1103_p2), %s199_s16, 1024, %s201_s21, [#allocation7], %s1866_s24, %s1866_s24, %s1867_s8  }
  0x28   : > { %s1932_s14 = smov (%p34_p3, %s33_s14), 0  ;;  %s1934_s15 = smov (!%p34_p3, %s36_s15), %s1484_s30 }
  0x29   : > { %1895 = sst [smem:[#allocation21_spill]] %s1932_s14  ;;  %s1654_s17 = ssub.s32 %s1480_s29, %s1932_s14 }
  0x2a   : > { %p1658_p9 = por %p53_p7, %p52_p5  ;;  %p38_p10 = scmp.ge.s32.totalorder %s1934_s15, 2 }
  0x2b   : > { %p69_p11 = scmp.eq.s32.totalorder %s1654_s17, 0  ;;  %s160_s21 = sadd.s32 1, %s1444_s20 }
  0x2c   : > { %s1936_s15 = smov (%p38_p10, %s1934_s15), 0  ;;  %s217_s24 = sand.u32 1, %s1468_s26  }
  0x2d   : > { %1897 = sst [smem:[#allocation22_spill]] %s1936_s15  ;;  %s978_s8 = sshll.u32 %s1484_s30, 5 }
  0x2e   : > { %s40_s14 = ssub.s32 %s1484_s30, %s1936_s15  ;;  %s895_s18 = sshll.u32 %s217_s24, 7 }
  0x2f   : > { %s42_s12 = sor.u32 %s1654_s17, %s40_s14  ;;  %p158_p2 = scmp.eq.s32.totalorder %s40_s14, 0 }
  0x30   : > { %p43_p3 = scmp.eq.s32.totalorder %s42_s12, 0  ;;  %s226_s28 = sadd.s32 %s1480_s29, %s978_s8 }
  0x31   : > { %s1673_s5 = scalar_select %p158_p2, %s1444_s20, %s160_s21  }
  0x32   : > { %s1676_s11 = scalar_select %p43_p3, %s1468_s26, %s45_s3  }
  0x33   : > { %1898 = sst [smem:[#allocation23_spill]] %s1673_s5  ;;  %s898_s4 = sshll.u32 %s226_s28, 3 }
  0x34   : > { %1899 = sst [smem:[#allocation24_spill]] %s1676_s11  ;;  %s221_s2 = scalar_lea.vmem [#allocation3], %s895_s18 }
  0x35   : > { %s231_s27 = sshll.u32 %s221_s2, 4  ;;  %s1900_s0 = sld [smem:[#allocation25_spill]]  ;;  %s232_s27 = int_to_ptr.vmem [resolvable:$true] %s231_s27 }
  0x36   : > { %p1107_p5 = pnand %p1118_p0, %p1658_p9  ;;  %s218_s3 = scalar_lea.sflag [#allocation4], %s217_s24 }
  0x37   : > { %s1493_s8 = smov 256   ;;  %s1494_s28 = smov 128  }
  0x38   : > { %s1495_s21 = smov 8   ;;  %s241_s18 = sand.u32 1, %s1488_s6  }
  0x39   : > { %s71_s2 = sadd.s32 1, %s1456_s23  ;;  %p78_p10 = scmp.ne.s32.totalorder %s1456_s23, %s1452_s22 }
  0x3a   : > { %s1693_s30 = scalar_select %p69_p11, %s1456_s23, %s71_s2  }
  0x3b   : > { %s228_s12 = scalar_lea.hbm %s1900_s0, %s898_s4  ;;  %p80_p2 = por %p78_p10, %p53_p7 }
  0x3c   : > { %s229_s14 = sshll.u32 %s228_s12, 4  ;;  %s243_s4 = sand.u32 1, %s1456_s23   ;;  %s230_s14 = int_to_ptr.hbm [resolvable:$true] %s229_s14 }
  0x3d   : > { %1109 = dma.hbm_to_vmem [thread:$0]  (!%p1107_p5), %s230_s14, 2048, %s232_s27, %s218_s3, %s1493_s8, %s1494_s28, %s1495_s21  }
  0x3e   : > { %s979_s15 = sshll.u32 %s1480_s29, 6  ;;  %s899_s16 = sshll.u32 %s243_s4, 6 }
  0x3f   : > { %s250_s24 = scalar_lea.hbm %s1861_s1, %s979_s15  ;;  %s245_s26 = scalar_lea.vmem [#allocation6], %s899_s16 }
  0x40   : > { %s251_s11 = sshll.u32 %s250_s24, 4  ;;  %s253_s5 = sshll.u32 %s245_s26, 4  ;;  %s252_s11 = int_to_ptr.hbm [resolvable:$true] %s251_s11  ;;  %s254_s5 = int_to_ptr.vmem [resolvable:$true] %s253_s5 }
  0x41   : > { %p1110_p9 = pnand %p1118_p0, %p80_p2  ;;  %s242_s27 = scalar_lea.sflag [#allocation7], %s241_s18 }
  0x42   : > { %s1901_s17 = smov 4   ;;  %s1902_s14 = smov 64  }
  0x43   : > { %1112 = dma.hbm_to_vmem [thread:$0]  (!%p1110_p9), %s252_s11, 1024, %s254_s5, %s242_s27, %s1902_s14, %s1902_s14, %s1901_s17  }
  0x44   : > { %265 = sbr.rel (%p1629_p13) target bundleno = 522 (0x20a), region = 40  ;;  %s267_s3 = sand.u32 (!%p1629_p13), 1, %s1464_s25  }
  0x45   : > { %s903_s0 = sshll.u32 (!%p1629_p13), %s267_s3, 7  ;;  %s268_s8 = scalar_lea.sflag (!%p1629_p13), [#allocation4], %s267_s3 }
  0x46   : > { %s1710_s28 = scalar_lea.vmem (!%p1629_p13), [#allocation3], %s903_s0 }
  0x49   : > { %1419 = dma.done.wait (%p1606_p4), %s268_s8, 2048  }
  0x4a   : > { %1421 = vsyncadd (%p1606_p4), %s268_s8, 4294965248  ;;  %s277_s26 = sand.u32 1, %s1596_s7   ;;  %s279_s5 = sand.u32 1, %s1452_s22  }
  0x4b   : > { %s904_s11 = sshll.u32 %s279_s5, 6  ;;  %s278_s13 = scalar_lea.sflag [#allocation7], %s277_s26 }
  0x4c   : > { %s1718_s21 = scalar_lea.vmem [#allocation6], %s904_s11 }
  0x4d   : > { %1423 = dma.done.wait (%p1613_p6), %s278_s13, 1024  }
  0x4e   : > { %1425 = vsyncadd (%p1613_p6), %s278_s13, 4294966272 }
  0x4f   : > { %1427 = dma.done.wait (%p59_p1), [#allocation7], 1024  }
  0x50   : > { %1429 = vsyncadd (%p59_p1), [#allocation7], 4294966272  ;;  %s316_s9 = sand.u32 1, %s1440_s19   ;;  %s1903_s4 = sld [smem:[#allocation16_spill]] }
  0x51   : > { %s906_s18 = sshll.u32 %s316_s9, 6 }
  0x52   : > { %s1731_s2 = scalar_lea.vmem [#allocation9], %s906_s18 }
  0x56   : > { %p907_p4 = scmp.ne.s32.totalorder %s1903_s4, 0 }
  0x58   : > { %325 = sbr.rel (%p907_p4) target bundleno = 110 (0x6e), region = 56 }
  0x5d   : > { %v1496_v0 = vmov 0.0  }
  0x5e   : > { %326 = vst [vmem:[#allocation2 + $0x30] sm:$0xff] %v1496_v0 }
  0x5f   : > { %327 = vst [vmem:[#allocation2] sm:$0xff] %v1496_v0 }
  0x60   : > { %328 = vst [vmem:[#allocation2 + $0x58] sm:$0xff] %v1496_v0 }
  0x61   : > { %329 = vst [vmem:[#allocation2 + $0x18] sm:$0xff] %v1496_v0 }
  0x62   : > { %330 = vst [vmem:[#allocation2 + $0x50] sm:$0xff] %v1496_v0 }
  0x63   : > { %331 = vst [vmem:[#allocation2 + $0x68] sm:$0xff] %v1496_v0 }
  0x64   : > { %332 = vst [vmem:[#allocation2 + $0x8] sm:$0xff] %v1496_v0 }
  0x65   : > { %333 = vst [vmem:[#allocation2 + $0x48] sm:$0xff] %v1496_v0 }
  0x66   : > { %334 = vst [vmem:[#allocation2 + $0x40] sm:$0xff] %v1496_v0 }
  0x67   : > { %335 = vst [vmem:[#allocation2 + $0x20] sm:$0xff] %v1496_v0 }
  0x68   : > { %336 = vst [vmem:[#allocation2 + $0x10] sm:$0xff] %v1496_v0 }
  0x69   : > { %337 = vst [vmem:[#allocation2 + $0x38] sm:$0xff] %v1496_v0 }
  0x6a   : > { %338 = vst [vmem:[#allocation2 + $0x60] sm:$0xff] %v1496_v0 }
  0x6b   : > { %339 = vst [vmem:[#allocation2 + $0x70] sm:$0xff] %v1496_v0 }
  0x6c   : > { %340 = vst [vmem:[#allocation2 + $0x78] sm:$0xff] %v1496_v0 }
  0x6d   : > { %341 = vst [vmem:[#allocation2 + $0x28] sm:$0xff] %v1496_v0 }
  0x6e PF: > { %v987_v1 = vld [vmem:[%s1718_s21 + $0x38] sm:$0xff]  ;;  %v986_v2 = vld [vmem:[%s1718_s21 + $0x30] sm:$0xff]  ;;  %v985_v3 = vld [vmem:[%s1718_s21 + $0x28] sm:$0xff]  ;;  %s1904_s7 = sld [smem:[#allocation16_spill]] }
  0x6f   : > { %446 = vmatpush.bf16.msra.mxu0 %v987_v1  ;;  %1044 = vmatpush.bf16.msra.mxu1 %v987_v1  ;;  %v984_v4 = vld [vmem:[%s1718_s21 + $0x20] sm:$0xff]  ;;  %v983_v5 = vld [vmem:[%s1718_s21 + $0x18] sm:$0xff]  ;;  %v982_v6 = vld [vmem:[%s1718_s21 + $0x10] sm:$0xff] }
  0x70   : > { %1045 = vmatpush.bf16.msra.mxu2 %v987_v1  ;;  %1046 = vmatpush.bf16.msra.mxu3 %v987_v1  ;;  %v981_v7 = vld [vmem:[%s1718_s21 + $0x8] sm:$0xff]  ;;  %v980_v8 = vld [vmem:[%s1718_s21] sm:$0xff]  ;;  %v360_v21 = vld [vmem:[%s1710_s28 + $0x10] sm:$0xff] }
  0x71   : > { %v358_v9 = vld [vmem:[%s1710_s28] sm:$0xff]  ;;  %v359_v10 = vld [vmem:[%s1710_s28 + $0x8] sm:$0xff]  ;;  %v361_v22 = vld [vmem:[%s1710_s28 + $0x18] sm:$0xff] }
  0x72   : > { %v362_v11 = vld [vmem:[%s1710_s28 + $0x20] sm:$0xff]  ;;  %v363_v12 = vld [vmem:[%s1710_s28 + $0x28] sm:$0xff]  ;;  %v374_v17 = vpack.c.bf16 %v359_v10, %v358_v9  ;;  %v364_v23 = vld [vmem:[%s1710_s28 + $0x30] sm:$0xff]  ;;  %v375_v29 = vpack.c.bf16 %v361_v22, %v360_v21 }
  0x73   : > { %447 = vmatpush.bf16.msra.mxu0 %v986_v2  ;;  %1047 = vmatpush.bf16.msra.mxu1 %v986_v2  ;;  %v366_v13 = vld [vmem:[%s1710_s28 + $0x40] sm:$0xff]  ;;  %v367_v14 = vld [vmem:[%s1710_s28 + $0x48] sm:$0xff]  ;;  %v376_v18 = vpack.c.bf16 %v363_v12, %v362_v11  ;;  %v365_v24 = vld [vmem:[%s1710_s28 + $0x38] sm:$0xff] }
  0x74   : > { %1048 = vmatpush.bf16.msra.mxu2 %v986_v2  ;;  %1049 = vmatpush.bf16.msra.mxu3 %v986_v2  ;;  %v370_v15 = vld [vmem:[%s1710_s28 + $0x60] sm:$0xff]  ;;  %v371_v16 = vld [vmem:[%s1710_s28 + $0x68] sm:$0xff]  ;;  %v378_v19 = vpack.c.bf16 %v367_v14, %v366_v13  ;;  %v368_v25 = vld [vmem:[%s1710_s28 + $0x50] sm:$0xff]  ;;  %v377_v30 = vpack.c.bf16 %v365_v24, %v364_v23  ;;  %p940_p1 = scmp.ne.s32.totalorder %s1904_s7, 1 }
  0x75   : > { %v380_v20 = vpack.c.bf16 %v371_v16, %v370_v15  ;;  %v369_v26 = vld [vmem:[%s1710_s28 + $0x58] sm:$0xff]  ;;  %v372_v27 = vld [vmem:[%s1710_s28 + $0x70] sm:$0xff]  ;;  %v350_v39 = vld [vmem:[#allocation2 + $0x40] sm:$0xff]  ;;  %s1905_s16 = sld [smem:[#allocation26_spill]] (!%p940_p1) }
  0x76   : > { %v373_v28 = vld [vmem:[%s1710_s28 + $0x78] sm:$0xff]  ;;  %v379_v31 = vpack.c.bf16 %v369_v26, %v368_v25  ;;  %v342_v33 = vld [vmem:[#allocation2 + $0x30] sm:$0xff]  ;;  %v354_v40 = vld [vmem:[#allocation2 + $0x60] sm:$0xff]  ;;  %s1906_s27 = sld [smem:[#allocation28_spill]] (!%p940_p1) }
  0x77   : > { %448 = vmatpush.bf16.msra.mxu0 %v985_v3  ;;  %1050 = vmatpush.bf16.msra.mxu1 %v985_v3  ;;  %v381_v32 = vpack.c.bf16 %v373_v28, %v372_v27  ;;  %v346_v34 = vld [vmem:[#allocation2 + $0x50] sm:$0xff]  ;;  %v343_v41 = vld [vmem:[#allocation2] sm:$0xff]  ;;  %v347_v42 = vld [vmem:[#allocation2 + $0x68] sm:$0xff] }
  0x78   : > { %1051 = vmatpush.bf16.msra.mxu2 %v985_v3  ;;  %1052 = vmatpush.bf16.msra.mxu3 %v985_v3  ;;  %v351_v51 = vld [vmem:[#allocation2 + $0x20] sm:$0xff]  ;;  %v355_v52 = vld [vmem:[#allocation2 + $0x70] sm:$0xff]  ;;  %v344_v53 = vld [vmem:[#allocation2 + $0x58] sm:$0xff] }
  0x79   : > { %v348_v54 = vld [vmem:[#allocation2 + $0x8] sm:$0xff]  ;;  %v352_v63 = vld [vmem:[#allocation2 + $0x10] sm:$0xff]  ;;  %v356_v0 = vld [vmem:[#allocation2 + $0x78] sm:$0xff] }
  0x7a   : > { %v345_v1 = vld [vmem:[#allocation2 + $0x18] sm:$0xff]  ;;  %v349_v2 = vld [vmem:[#allocation2 + $0x48] sm:$0xff] }
  0x7b   : > { %449 = vmatpush.bf16.msra.mxu0 %v984_v4  ;;  %1053 = vmatpush.bf16.msra.mxu1 %v984_v4  ;;  %v353_v11 = vld [vmem:[#allocation2 + $0x38] sm:$0xff]  ;;  %v357_v12 = vld [vmem:[#allocation2 + $0x28] sm:$0xff] }
  0x7c   : > { %1054 = vmatpush.bf16.msra.mxu2 %v984_v4  ;;  %1055 = vmatpush.bf16.msra.mxu3 %v984_v4 }
  0x7f   : > { %450 = vmatpush.bf16.msra.mxu0 %v983_v5  ;;  %1056 = vmatpush.bf16.msra.mxu1 %v983_v5 }
  0x80   : > { %1057 = vmatpush.bf16.msra.mxu2 %v983_v5  ;;  %1058 = vmatpush.bf16.msra.mxu3 %v983_v5 }
  0x83   : > { %451 = vmatpush.bf16.msra.mxu0 %v982_v6  ;;  %1059 = vmatpush.bf16.msra.mxu1 %v982_v6 }
  0x84   : > { %1060 = vmatpush.bf16.msra.mxu2 %v982_v6  ;;  %1061 = vmatpush.bf16.msra.mxu3 %v982_v6 }
  0x87   : > { %452 = vmatpush.bf16.msra.mxu0 %v981_v7  ;;  %1062 = vmatpush.bf16.msra.mxu1 %v981_v7 }
  0x88   : > { %1063 = vmatpush.bf16.msra.mxu2 %v981_v7  ;;  %1064 = vmatpush.bf16.msra.mxu3 %v981_v7 }
  0x8b   : > { %453 = vmatpush.bf16.msra.mxu0 %v980_v8  ;;  %1065 = vmatpush.bf16.msra.mxu1 %v980_v8 }
  0x8c   : > { %1066 = vmatpush.bf16.msra.mxu2 %v980_v8  ;;  %1067 = vmatpush.bf16.msra.mxu3 %v980_v8 }
  0x8e   : > { %454 = vmatmul.bf16.vlgmr.msra.gmra.mxu0 %v374_v17  ;;  %464 = vmatmul.bf16.vlgmr.msra.gmra.mxu1 %v376_v18 }
  0x8f   : > { %474 = vmatmul.bf16.vlgmr.msra.gmra.mxu2 %v378_v19  ;;  %484 = vmatmul.bf16.vlgmr.msra.gmra.mxu3 %v380_v20 }
  0x9e   : > { %459 = vmatmul.bf16.gmra.mxu0 %v375_v29  ;;  %469 = vmatmul.bf16.gmra.mxu1 %v377_v30 }
  0x9f   : > { %479 = vmatmul.bf16.gmra.mxu2 %v379_v31  ;;  %489 = vmatmul.bf16.gmra.mxu3 %v381_v32 }
 0x10b   : > { %v455_v35 = vpop.f32.mrf.mxu0  ;;  %v465_v36 = vpop.f32.mrf.mxu1 }
 0x10c   : > { %v495_v37 = vadd.f32 %v455_v35, %v342_v33  ;;  %v499_v38 = vadd.f32 %v465_v36, %v346_v34 }
 0x10e   : > { %511 = vst [vmem:[#allocation2 + $0x30] sm:$0xff] %v495_v37 }
 0x10f   : > { %515 = vst [vmem:[#allocation2 + $0x50] sm:$0xff] %v499_v38 }
 0x112   : > { %v475_v43 = vpop.f32.mrf.mxu2  ;;  %v485_v44 = vpop.f32.mrf.mxu3 }
 0x113   : > { %v503_v45 = vadd.f32 %v475_v43, %v350_v39  ;;  %v507_v46 = vadd.f32 %v485_v44, %v354_v40  ;;  %v457_v47 = vpop.f32.mrf.mxu0  ;;  %v467_v48 = vpop.f32.mrf.mxu1 }
 0x114   : > { %v496_v49 = vadd.f32 %v457_v47, %v343_v41  ;;  %v500_v50 = vadd.f32 %v467_v48, %v347_v42 }
 0x115   : > { %519 = vst [vmem:[#allocation2 + $0x40] sm:$0xff] %v503_v45 }
 0x116   : > { %523 = vst [vmem:[#allocation2 + $0x60] sm:$0xff] %v507_v46 }
 0x117   : > { %512 = vst [vmem:[#allocation2] sm:$0xff] %v496_v49 }
 0x118   : > { %516 = vst [vmem:[#allocation2 + $0x68] sm:$0xff] %v500_v50 }
 0x11a   : > { %v477_v55 = vpop.f32.mrf.mxu2  ;;  %v487_v56 = vpop.f32.mrf.mxu3 }
 0x11b   : > { %v504_v57 = vadd.f32 %v477_v55, %v351_v51  ;;  %v508_v58 = vadd.f32 %v487_v56, %v355_v52  ;;  %v460_v59 = vpop.f32.mrf.mxu0  ;;  %v470_v60 = vpop.f32.mrf.mxu1 }
 0x11c   : > { %v497_v61 = vadd.f32 %v460_v59, %v344_v53  ;;  %v501_v62 = vadd.f32 %v470_v60, %v348_v54 }
 0x11d   : > { %520 = vst [vmem:[#allocation2 + $0x20] sm:$0xff] %v504_v57 }
 0x11e   : > { %524 = vst [vmem:[#allocation2 + $0x70] sm:$0xff] %v508_v58 }
 0x11f   : > { %513 = vst [vmem:[#allocation2 + $0x58] sm:$0xff] %v497_v61 }
 0x120   : > { %517 = vst [vmem:[#allocation2 + $0x8] sm:$0xff] %v501_v62 }
 0x122   : > { %v480_v3 = vpop.f32.mrf.mxu2  ;;  %v490_v4 = vpop.f32.mrf.mxu3 }
 0x123   : > { %v505_v5 = vadd.f32 %v480_v3, %v352_v63  ;;  %v509_v6 = vadd.f32 %v490_v4, %v356_v0  ;;  %v462_v7 = vpop.f32.mrf.mxu0  ;;  %v472_v8 = vpop.f32.mrf.mxu1 }
 0x124   : > { %v498_v9 = vadd.f32 %v462_v7, %v345_v1  ;;  %v502_v10 = vadd.f32 %v472_v8, %v349_v2 }
 0x125   : > { %521 = vst [vmem:[#allocation2 + $0x10] sm:$0xff] %v505_v5 }
 0x126   : > { %525 = vst [vmem:[#allocation2 + $0x78] sm:$0xff] %v509_v6 }
 0x127   : > { %514 = vst [vmem:[#allocation2 + $0x18] sm:$0xff] %v498_v9 }
 0x128   : > { %518 = vst [vmem:[#allocation2 + $0x48] sm:$0xff] %v502_v10 }
 0x12a   : > { %v482_v13 = vpop.f32.mrf.mxu2  ;;  %v492_v14 = vpop.f32.mrf.mxu3  ;;  %530 = sbr.rel (%p940_p1) target bundleno = 500 (0x1f4), region = 60 }
 0x12b   : > { %v506_v15 = vadd.f32 %v482_v13, %v353_v11  ;;  %v510_v16 = vadd.f32 %v492_v14, %v357_v12 }
 0x12d   : > { %522 = vst [vmem:[#allocation2 + $0x38] sm:$0xff] %v506_v15 }
 0x12e   : > { %526 = vst [vmem:[#allocation2 + $0x28] sm:$0xff] %v510_v16 }
 0x12f   : > { %v995_v17 = vld [vmem:[#allocation8 + $0x38] sm:$0xff]  ;;  %v994_v18 = vld [vmem:[#allocation8 + $0x30] sm:$0xff]  ;;  %v993_v19 = vld [vmem:[#allocation8 + $0x28] sm:$0xff] }
 0x130   : > { %659 = vmatpush.bf16.msra.mxu0 %v995_v17  ;;  %1068 = vmatpush.bf16.msra.mxu1 %v995_v17  ;;  %v992_v20 = vld [vmem:[#allocation8 + $0x20] sm:$0xff]  ;;  %v991_v21 = vld [vmem:[#allocation8 + $0x18] sm:$0xff]  ;;  %v990_v23 = vld [vmem:[#allocation8 + $0x10] sm:$0xff] }
 0x131   : > { %1069 = vmatpush.bf16.msra.mxu2 %v995_v17  ;;  %1070 = vmatpush.bf16.msra.mxu3 %v995_v17  ;;  %v1762_v22 = vld [vmem:[%s1905_s16] ss:$0 sm:$0xff]  ;;  %v531_v24 = vld [vmem:[#allocation2 + $0x30] sm:$0xff]  ;;  %v536_v27 = vld [vmem:[#allocation2 + $0x68] sm:$0xff] }
 0x132   : > { %v532_v25 = vld [vmem:[#allocation2] sm:$0xff]  ;;  %v535_v26 = vld [vmem:[#allocation2 + $0x50] sm:$0xff]  ;;  %v551_v32 = vadd.f32 %v1762_v22, %v531_v24  ;;  %v556_v35 = vadd.f32 %v1762_v22, %v536_v27  ;;  %v989_v37 = vld [vmem:[#allocation8 + $0x8] sm:$0xff] }
 0x133   : > { %v539_v28 = vld [vmem:[#allocation2 + $0x40] sm:$0xff]  ;;  %v544_v31 = vld [vmem:[#allocation2 + $0x70] sm:$0xff]  ;;  %v552_v33 = vadd.f32 %v1762_v22, %v532_v25  ;;  %v555_v34 = vadd.f32 %v1762_v22, %v535_v26  ;;  %v533_v54 = vld [vmem:[#allocation2 + $0x58] sm:$0xff] }
 0x134   : > { %660 = vmatpush.bf16.msra.mxu0 %v994_v18  ;;  %1071 = vmatpush.bf16.msra.mxu1 %v994_v18  ;;  %v540_v29 = vld [vmem:[#allocation2 + $0x20] sm:$0xff]  ;;  %v559_v36 = vadd.f32 %v1762_v22, %v539_v28  ;;  %v564_v40 = vadd.f32 %v1762_v22, %v544_v31  ;;  %v567_v41 = vmax.f32 %v551_v32, 0.0  ;;  %v572_v44 = vmax.f32 %v556_v35, 0.0  ;;  %v534_v55 = vld [vmem:[#allocation2 + $0x18] sm:$0xff]  ;;  %v537_v56 = vld [vmem:[#allocation2 + $0x8] sm:$0xff] }
 0x135   : > { %1072 = vmatpush.bf16.msra.mxu2 %v994_v18  ;;  %1073 = vmatpush.bf16.msra.mxu3 %v994_v18  ;;  %v543_v30 = vld [vmem:[#allocation2 + $0x60] sm:$0xff]  ;;  %v560_v38 = vadd.f32 %v1762_v22, %v540_v29  ;;  %v568_v42 = vmax.f32 %v552_v33, 0.0  ;;  %v571_v43 = vmax.f32 %v555_v34, 0.0  ;;  %v538_v57 = vld [vmem:[#allocation2 + $0x48] sm:$0xff]  ;;  %v541_v58 = vld [vmem:[#allocation2 + $0x10] sm:$0xff]  ;;  %v553_v62 = vadd.f32 %v1762_v22, %v533_v54 }
 0x136   : > { %v563_v39 = vadd.f32 %v1762_v22, %v543_v30  ;;  %v988_v45 = vld [vmem:[#allocation8] sm:$0xff]  ;;  %v575_v46 = vmax.f32 %v559_v36, 0.0  ;;  %v580_v49 = vmax.f32 %v564_v40, 0.0  ;;  %v542_v59 = vld [vmem:[#allocation2 + $0x38] sm:$0xff]  ;;  %v546_v61 = vld [vmem:[#allocation2 + $0x28] sm:$0xff]  ;;  %v554_v63 = vadd.f32 %v1762_v22, %v534_v55 }
 0x137   : > { %v576_v47 = vmax.f32 %v560_v38, 0.0  ;;  %v583_v50 = vpack.c.bf16 %v568_v42, %v567_v41  ;;  %v585_v51 = vpack.c.bf16 %v572_v44, %v571_v43  ;;  %v545_v60 = vld [vmem:[#allocation2 + $0x78] sm:$0xff]  ;;  %v557_v0 = vadd.f32 %v1762_v22, %v537_v56 }
 0x138   : > { %661 = vmatpush.bf16.msra.mxu0 %v993_v19  ;;  %1074 = vmatpush.bf16.msra.mxu1 %v993_v19  ;;  %v579_v48 = vmax.f32 %v563_v39, 0.0  ;;  %v558_v1 = vadd.f32 %v1762_v22, %v538_v57  ;;  %v561_v2 = vadd.f32 %v1762_v22, %v541_v58  ;;  %v562_v3 = vadd.f32 %v1762_v22, %v542_v59 }
 0x139   : > { %1075 = vmatpush.bf16.msra.mxu2 %v993_v19  ;;  %1076 = vmatpush.bf16.msra.mxu3 %v993_v19  ;;  %v587_v52 = vpack.c.bf16 %v576_v47, %v575_v46  ;;  %v565_v4 = vadd.f32 %v1762_v22, %v545_v60  ;;  %v566_v5 = vadd.f32 %v1762_v22, %v546_v61  ;;  %v569_v6 = vmax.f32 %v553_v62, 0.0 }
 0x13a   : > { %v589_v53 = vpack.c.bf16 %v580_v49, %v579_v48  ;;  %v570_v7 = vmax.f32 %v554_v63, 0.0  ;;  %v573_v8 = vmax.f32 %v557_v0, 0.0  ;;  %v574_v9 = vmax.f32 %v558_v1, 0.0 }
 0x13b   : > { %v577_v10 = vmax.f32 %v561_v2, 0.0  ;;  %v578_v11 = vmax.f32 %v562_v3, 0.0  ;;  %v581_v12 = vmax.f32 %v565_v4, 0.0  ;;  %v582_v13 = vmax.f32 %v566_v5, 0.0 }
 0x13c   : > { %662 = vmatpush.bf16.msra.mxu0 %v992_v20  ;;  %1077 = vmatpush.bf16.msra.mxu1 %v992_v20  ;;  %v584_v14 = vpack.c.bf16 %v570_v7, %v569_v6  ;;  %v586_v15 = vpack.c.bf16 %v574_v9, %v573_v8 }
 0x13d   : > { %1078 = vmatpush.bf16.msra.mxu2 %v992_v20  ;;  %1079 = vmatpush.bf16.msra.mxu3 %v992_v20  ;;  %v588_v16 = vpack.c.bf16 %v578_v11, %v577_v10  ;;  %v590_v17 = vpack.c.bf16 %v582_v13, %v581_v12  ;;  %v1243_v20 = vld [vmem:[%s1906_s27] ss:$0 sm:$0xff] }
 0x140   : > { %663 = vmatpush.bf16.msra.mxu0 %v991_v21  ;;  %1080 = vmatpush.bf16.msra.mxu1 %v991_v21 }
 0x141   : > { %1081 = vmatpush.bf16.msra.mxu2 %v991_v21  ;;  %1082 = vmatpush.bf16.msra.mxu3 %v991_v21 }
 0x144   : > { %664 = vmatpush.bf16.msra.mxu0 %v990_v23  ;;  %1083 = vmatpush.bf16.msra.mxu1 %v990_v23 }
 0x145   : > { %1084 = vmatpush.bf16.msra.mxu2 %v990_v23  ;;  %1085 = vmatpush.bf16.msra.mxu3 %v990_v23 }
 0x148   : > { %665 = vmatpush.bf16.msra.mxu0 %v989_v37  ;;  %1086 = vmatpush.bf16.msra.mxu1 %v989_v37 }
 0x149   : > { %1087 = vmatpush.bf16.msra.mxu2 %v989_v37  ;;  %1088 = vmatpush.bf16.msra.mxu3 %v989_v37 }
 0x14c   : > { %666 = vmatpush.bf16.msra.mxu0 %v988_v45  ;;  %1089 = vmatpush.bf16.msra.mxu1 %v988_v45 }
 0x14d   : > { %1090 = vmatpush.bf16.msra.mxu2 %v988_v45  ;;  %1091 = vmatpush.bf16.msra.mxu3 %v988_v45 }
 0x14f   : > { %667 = vmatmul.bf16.vlgmr.msra.gmra.mxu0 %v583_v50  ;;  %677 = vmatmul.bf16.vlgmr.msra.gmra.mxu1 %v585_v51 }
 0x150   : > { %687 = vmatmul.bf16.vlgmr.msra.gmra.mxu2 %v587_v52  ;;  %697 = vmatmul.bf16.vlgmr.msra.gmra.mxu3 %v589_v53 }
 0x15f   : > { %672 = vmatmul.bf16.gmra.mxu0 %v584_v14  ;;  %682 = vmatmul.bf16.gmra.mxu1 %v586_v15 }
 0x160   : > { %692 = vmatmul.bf16.gmra.mxu2 %v588_v16  ;;  %702 = vmatmul.bf16.gmra.mxu3 %v590_v17 }
 0x1cc   : > { %v668_v18 = vpop.f32.mrf.mxu0  ;;  %v678_v19 = vpop.f32.mrf.mxu1 }
 0x1cd   : > { %v669_v21 = vadd.f32 %v1243_v20, %v668_v18  ;;  %v679_v22 = vadd.f32 %v1243_v20, %v678_v19 }
 0x1cf   : > { %v708_v29 = vmax.f32 %v669_v21, 0.0  ;;  %v712_v30 = vmax.f32 %v679_v22, 0.0 }
 0x1d3   : > { %v688_v23 = vpop.f32.mrf.mxu2  ;;  %v698_v24 = vpop.f32.mrf.mxu3 }
 0x1d4   : > { %v670_v25 = vpop.f32.mrf.mxu0  ;;  %v680_v26 = vpop.f32.mrf.mxu1  ;;  %v689_v35 = vadd.f32 %v1243_v20, %v688_v23  ;;  %v699_v36 = vadd.f32 %v1243_v20, %v698_v24 }
 0x1d5   : > { %v671_v27 = vadd.f32 %v1243_v20, %v670_v25  ;;  %v681_v28 = vadd.f32 %v1243_v20, %v680_v26 }
 0x1d6   : > { %v716_v43 = vmax.f32 %v689_v35, 0.0  ;;  %v720_v44 = vmax.f32 %v699_v36, 0.0 }
 0x1d7   : > { %v709_v31 = vmax.f32 %v671_v27, 0.0  ;;  %v713_v32 = vmax.f32 %v681_v28, 0.0 }
 0x1d9   : > { %v1000_v33 = vpack.c.bf16 %v709_v31, %v708_v29  ;;  %v1010_v34 = vpack.c.bf16 %v713_v32, %v712_v30 }
 0x1db   : > { %1001 = vst [vmem:[%s1731_s2] sm:$0xff] %v1000_v33   ;;  %v690_v37 = vpop.f32.mrf.mxu2  ;;  %v700_v38 = vpop.f32.mrf.mxu3 }
 0x1dc   : > { %1038 = vst [vmem:[%s1731_s2 + $0x10] sm:$0xff] %v1010_v34   ;;  %v691_v39 = vadd.f32 %v1243_v20, %v690_v37  ;;  %v701_v40 = vadd.f32 %v1243_v20, %v700_v38  ;;  %v673_v41 = vpop.f32.mrf.mxu0  ;;  %v683_v42 = vpop.f32.mrf.mxu1 }
 0x1dd   : > { %v674_v49 = vadd.f32 %v1243_v20, %v673_v41  ;;  %v684_v50 = vadd.f32 %v1243_v20, %v683_v42 }
 0x1de   : > { %v717_v45 = vmax.f32 %v691_v39, 0.0  ;;  %v721_v46 = vmax.f32 %v701_v40, 0.0 }
 0x1df   : > { %v710_v57 = vmax.f32 %v674_v49, 0.0  ;;  %v714_v58 = vmax.f32 %v684_v50, 0.0 }
 0x1e0   : > { %v1020_v47 = vpack.c.bf16 %v717_v45, %v716_v43  ;;  %v1030_v48 = vpack.c.bf16 %v721_v46, %v720_v44 }
 0x1e2   : > { %1040 = vst [vmem:[%s1731_s2 + $0x20] sm:$0xff] %v1020_v47  }
 0x1e3   : > { %1042 = vst [vmem:[%s1731_s2 + $0x30] sm:$0xff] %v1030_v48   ;;  %v693_v51 = vpop.f32.mrf.mxu2  ;;  %v703_v52 = vpop.f32.mrf.mxu3 }
 0x1e4   : > { %v675_v53 = vpop.f32.mrf.mxu0  ;;  %v685_v54 = vpop.f32.mrf.mxu1  ;;  %v694_v63 = vadd.f32 %v1243_v20, %v693_v51  ;;  %v704_v0 = vadd.f32 %v1243_v20, %v703_v52 }
 0x1e5   : > { %v676_v55 = vadd.f32 %v1243_v20, %v675_v53  ;;  %v686_v56 = vadd.f32 %v1243_v20, %v685_v54 }
 0x1e6   : > { %v718_v5 = vmax.f32 %v694_v63, 0.0  ;;  %v722_v6 = vmax.f32 %v704_v0, 0.0 }
 0x1e7   : > { %v711_v59 = vmax.f32 %v676_v55, 0.0  ;;  %v715_v60 = vmax.f32 %v686_v56, 0.0 }
 0x1e9   : > { %v1005_v61 = vpack.c.bf16 %v711_v59, %v710_v57  ;;  %v1015_v62 = vpack.c.bf16 %v715_v60, %v714_v58 }
 0x1eb   : > { %1037 = vst [vmem:[%s1731_s2 + $0x8] sm:$0xff] %v1005_v61   ;;  %v695_v1 = vpop.f32.mrf.mxu2  ;;  %v705_v2 = vpop.f32.mrf.mxu3 }
 0x1ec   : > { %1039 = vst [vmem:[%s1731_s2 + $0x18] sm:$0xff] %v1015_v62   ;;  %v696_v3 = vadd.f32 %v1243_v20, %v695_v1  ;;  %v706_v4 = vadd.f32 %v1243_v20, %v705_v2 }
 0x1ee   : > { %v719_v7 = vmax.f32 %v696_v3, 0.0  ;;  %v723_v8 = vmax.f32 %v706_v4, 0.0 }
 0x1f0   : > { %v1025_v9 = vpack.c.bf16 %v719_v7, %v718_v5  ;;  %v1035_v10 = vpack.c.bf16 %v723_v8, %v722_v6 }
 0x1f2   : > { %1041 = vst [vmem:[%s1731_s2 + $0x28] sm:$0xff] %v1025_v9  }
 0x1f3   : > { %1043 = vst [vmem:[%s1731_s2 + $0x38] sm:$0xff] %v1035_v10  }
 0x1f4 PF: > { %s1907_s17 = sld [smem:[#allocation17_spill]]  ;;  %s769_s11 = sshll.u32 %s1731_s2, 4  ;;  %s770_s11 = int_to_ptr.vmem [resolvable:$true] %s769_s11 }
 0x1f5   : > { %s1909_s28 = sld [smem:[#allocation29_spill]]  ;;  %s757_s21 = scalar_lea.sflag [#allocation5], %s316_s9 }
 0x1fa   : > { %s996_s3 = sshll.u32 %s1907_s17, 6 }
 0x1fb   : > { %s1910_s5 = smov %s1909_s28  ;;  %s768_s26 = scalar_lea.hbm %s1909_s28, %s996_s3 }
 0x1fc   : > { %s771_s13 = sshll.u32 %s768_s26, 4  ;;  %s1354_s15 = scalar_lea.hbm %s1910_s5, 128  ;;  %s772_s13 = int_to_ptr.hbm [resolvable:$true] %s771_s13 }
 0x1fd   : > { %s1348_s18 = sshra.s32 %s772_s13, 4  ;;  %s1349_s18 = int_to_ptr.hbm [resolvable:$true] %s1348_s18 }
 0x1fe   : > { %s1350_s4 = scalar_lea.hbm %s1349_s18, 64  ;;  %p1355_p11 = scmp.lt.s32.totalorder %s1349_s18, %s1910_s5 }
 0x1ff   : > { %p1351_p6 = scmp.ne.s32.totalorder %s1349_s18, %s1350_s4  ;;  %p1356_p0 = scmp.lt.s32.totalorder %s1354_s15, %s1350_s4 }
 0x201   : > { %p1352_p13 = pnand %p1351_p6, %p1619_p8  ;;  %p1357_p3 = por %p1356_p0, %p1355_p11 }
 0x203   : > { %p1353_p7 = pneg %p1352_p13 }
 0x205   : > { %p1358_p5 = pnand %p1357_p3, %p1353_p7 }
 0x207   : > { %1361 = shalt.err (!%p1358_p5)
}
 0x208   : > { %s1497_s9 = smov 64   ;;  %s1498_s2 = smov 4  }
 0x209   : > { %1100 = dma.vmem_to_hbm [thread:$0]  (%p1619_p8), %s770_s11, 1024, %s772_s13, %s757_s21, %s1497_s9, %s1497_s9, %s1498_s2  }
 0x20a PF: > { %s1911_s24 = sld [smem:[#allocation14_spill]]  ;;  %p1120_p10 = scmp.ge.s32.totalorder %s1488_s6, 2 }
 0x20c   : > { %p1114_p2 = pnand %p1120_p10, %p1625_p12 }
 0x20e   : > { %p1115_p9 = pneg %p1114_p2 }
 0x210   : > { %s786_s17 = sand.u32 1, %s1911_s24  }
 0x211   : > { %s787_s3 = scalar_lea.sflag [#allocation5], %s786_s17 }
 0x212   : > { %1431 = dma.done.wait (%p1115_p9), %s787_s3, 1024  }
 0x213   : > { %1433 = vsyncadd (%p1115_p9), %s787_s3, 4294966272  ;;  %s24_s6 = sadd.s32 1, %s1488_s6   ;;  %s1914_s14 = sld [smem:[#allocation23_spill]] }
 0x214   : > { %p1813_p4 = scmp.ge.s32.totalorder %s24_s6, 6   ;;  %s1915_s8 = sld [smem:[#allocation15_spill]] }
 0x215   : > { %s1916_s26 = sld [smem:[#allocation24_spill]]  ;;  %s1920_s18 = smov %s1440_s19 }
 0x216   : > { %s1917_s28 = sld [smem:[#allocation18_spill]]  ;;  %s1921_s19 = smov %s1444_s20 }
 0x217   : > { %s1918_s11 = sld [smem:[#allocation21_spill]]  ;;  %s1923_s21 = smov %s1452_s22 }
 0x218   : > { %s1919_s13 = sld [smem:[#allocation22_spill]]  ;;  %s1924_s22 = smov %s1456_s23 }
 0x219   : > { %s1922_s20 = smov %s1914_s14  ;;  %s1925_s23 = smov %s1693_s30 }
 0x21a   : > { %s1926_s24 = smov %s1464_s25  ;;  %s1927_s25 = smov %s1915_s8 }
 0x21b   : > { %s1928_s27 = smov %s1480_s29  ;;  %23 = sbr.rel (!%p1813_p4) target bundleno = 18 (0x12), region = 110 }
 0x21d   : > { %s1929_s29 = smov %s1918_s11 }
 0x21e   : > { %s1930_s30 = smov %s1919_s13 }
 0x220   :  { %793 = vsyncpa [#allocation4], 1 }
 0x221   :  { %795 = vsyncpa [#allocation4 + $0x1], 1 }
 0x222   :  { %796 = vsyncpa [#allocation7], 1 }
 0x223   :  { %798 = vsyncpa [#allocation7 + $0x1], 1 }
 0x224   :  { %799 = vsyncpa [#allocation5], 1 }
 0x225   :  { %801 = vsyncpa [#allocation5 + $0x1], 1 }

</bundles_post_ra>
